<compile_context>
chip_gen: v7x
topology: tpu7x:2x2x1
jax: 0.10.0
libtpu: 0.0.40
codegen_flags: <defaults>
</compile_context>

<pallas_src>
import functools

import jax
import jax.numpy as jnp
from jax.experimental import pallas as pl
from jax.experimental.pallas import tpu as pltpu

EPS = 1e-5            # BatchNorm2d default eps
LANE = 128
TM_MAX = 512          # M tile (rows of the im2col matrix)
FULL_K_MAX = 2048     # up to this K, use one full-K block (no K padding)
TK_BIG = 512          # K tile when K > FULL_K_MAX


def _round_up(x, m):
    return (x + m - 1) // m * m


def _vmem_limit(tile_bytes):
    # Explicit scoped-VMEM budget derived from the tile sizes (double
    # buffering already counted in tile_bytes) with headroom; never below the
    # 32 MiB default, capped well under v7x's 64 MiB physical VMEM.
    return int(min(100 * 1024 * 1024,
                   max(tile_bytes * 1.5 + (4 << 20), 32 * 1024 * 1024)))


# -----------------------------------------------------------------------------
# Kernel 1: M-tiled GEMM (patches @ weights) + per-M-tile BN partial statistics
# -----------------------------------------------------------------------------
def _gemm_stats_kernel(a_ref, w_ref, y_ref, st_ref):
    k = pl.program_id(1)

    @pl.when(k == 0)
    def _():
        y_ref[...] = jnp.zeros_like(y_ref)

    # f32 accumulation directly into the output block (no extra acc scratch).
    y_ref[...] += jnp.dot(a_ref[...], w_ref[...],
                          preferred_element_type=jnp.float32)

    @pl.when(k == pl.num_programs(1) - 1)
    def _():
        y = y_ref[...]                                   # (TM, CP) f32
        s = jnp.sum(y, axis=0, keepdims=True)            # (1, CP)
        ss = jnp.sum(y * y, axis=0, keepdims=True)       # (1, CP)
        rows = jax.lax.broadcasted_iota(jnp.int32, (8, y.shape[1]), 0)
        st_ref[...] = jnp.where(rows == 0, s, jnp.where(rows == 1, ss, 0.0))


# -----------------------------------------------------------------------------
# Kernel 2: normalize (+ residual) (+ ReLU), M-tiled elementwise pass
# -----------------------------------------------------------------------------
def _bn_act_kernel(y_ref, sc_ref, sh_ref, o_ref, *, relu):
    y = y_ref[...] * sc_ref[...] + sh_ref[...]
    if relu:
        y = jnp.maximum(y, 0.0)
    o_ref[...] = y


def _bn_act_res_kernel(y_ref, sc_ref, sh_ref, r_ref, o_ref, *, relu):
    y = y_ref[...] * sc_ref[...] + sh_ref[...] + r_ref[...]
    if relu:
        y = jnp.maximum(y, 0.0)
    o_ref[...] = y


# -----------------------------------------------------------------------------
# im2col (JAX glue)
# -----------------------------------------------------------------------------
def _im2col(x, kh, kw, stride, pad):
    """x: [N, H, W, C] -> patches [N*Ho*Wo, kh*kw*C], Ho, Wo."""
    # TODO(synk): fuse im2col into kernel 1 (halo'd NHWC tiles + kh*kw shifted
    # dots) so the expanded patches matrix never hits HBM.
    if pad > 0:
        x = jnp.pad(x, ((0, 0), (pad, pad), (pad, pad), (0, 0)))
    n, h, w, c = x.shape
    ho = (h - kh) // stride + 1
    wo = (w - kw) // stride + 1
    cols = []
    for i in range(kh):
        for j in range(kw):
            cols.append(x[:, i:i + stride * (ho - 1) + 1:stride,
                          j:j + stride * (wo - 1) + 1:stride, :])
    p = jnp.stack(cols, axis=3)                    # [N, Ho, Wo, kh*kw, C]
    return p.reshape(n * ho * wo, kh * kw * c), ho, wo


# -----------------------------------------------------------------------------
# Fused Conv + BN(train) (+ residual) (+ ReLU)
# -----------------------------------------------------------------------------
def conv_bn_act(x, w, gamma, beta, stride, pad, relu, residual=None):
    """x: [N,H,W,Cin] NHWC f32.  w: [Cout,Cin,kh,kw] (PyTorch layout).
    residual (optional): [N,Ho,Wo,Cout] f32, added after BN, before ReLU."""
    n = x.shape[0]
    cout, cin, kh, kw = w.shape

    patches, ho, wo = _im2col(x.astype(jnp.bfloat16), kh, kw, stride, pad)
    m, k = patches.shape

    # --- tile geometry -------------------------------------------------------
    tm = TM_MAX if m >= TM_MAX else _round_up(m, 16)   # bf16 sublane packing
    mp = _round_up(m, tm)
    nm = mp // tm
    if k <= FULL_K_MAX:
        kp, tkb, nk = k, k, 1                          # single full-K block
    else:
        kp = _round_up(k, TK_BIG)
        tkb, nk = TK_BIG, kp // TK_BIG
    cp = _round_up(cout, LANE)                         # lane-dense out block

    a = jnp.pad(patches, ((0, mp - m), (0, kp - k)))
    wm = jnp.pad(
        jnp.transpose(w, (2, 3, 1, 0)).reshape(k, cout).astype(jnp.bfloat16),
        ((0, kp - k), (0, cp - cout)))

    # --- kernel 1: GEMM + partial BN statistics ------------------------------
    vmem1 = 2 * (tm * tkb + tkb * cp) * 2 + 2 * (tm * cp + 8 * cp) * 4
    y, stats = pl.pallas_call(
        _gemm_stats_kernel,
        out_shape=(jax.ShapeDtypeStruct((mp, cp), jnp.float32),
                   jax.ShapeDtypeStruct((nm * 8, cp), jnp.float32)),
        grid_spec=pltpu.PrefetchScalarGridSpec(
            num_scalar_prefetch=0,
            grid=(nm, nk),
            in_specs=[
                pl.BlockSpec((tm, tkb), lambda mi, ki: (mi, ki)),   # patches
                pl.BlockSpec((tkb, cp), lambda mi, ki: (ki, 0)),    # weights
            ],
            out_specs=(
                pl.BlockSpec((tm, cp), lambda mi, ki: (mi, 0)),     # conv out
                pl.BlockSpec((8, cp), lambda mi, ki: (mi, 0)),      # partials
            ),
        ),
        compiler_params=pltpu.CompilerParams(
            dimension_semantics=("parallel", "arbitrary"),
            vmem_limit_bytes=_vmem_limit(vmem1)),
    )(a, wm)

    # --- finalize BatchNorm statistics (training-mode, biased variance) ------
    # Padded rows of `a` are exactly zero, so padded rows of y are exactly
    # zero (also in bf16) and dividing by the true M is correct.
    st = stats.reshape(nm, 8, cp)
    mean = jnp.sum(st[:, 0, :], axis=0) / m
    var = jnp.maximum(jnp.sum(st[:, 1, :], axis=0) / m - mean * mean, 0.0)
    gamma_p = jnp.pad(gamma.astype(jnp.float32), (0, cp - cout))
    beta_p = jnp.pad(beta.astype(jnp.float32), (0, cp - cout))
    scale = (gamma_p * jax.lax.rsqrt(var + EPS)).reshape(1, cp)
    shift = (beta_p - mean * scale[0]).reshape(1, cp)

    # --- kernel 2: normalize (+ residual) (+ ReLU) ---------------------------
    in_specs = [
        pl.BlockSpec((tm, cp), lambda mi: (mi, 0)),    # raw conv output
        pl.BlockSpec((1, cp), lambda mi: (0, 0)),      # scale
        pl.BlockSpec((1, cp), lambda mi: (0, 0)),      # shift
    ]
    args = [y, scale, shift]
    if residual is not None:
        r = jnp.pad(residual.astype(jnp.float32).reshape(m, cout),
                    ((0, mp - m), (0, cp - cout)))
        in_specs.append(pl.BlockSpec((tm, cp), lambda mi: (mi, 0)))
        args.append(r)
        kernel2 = functools.partial(_bn_act_res_kernel, relu=relu)
    else:
        kernel2 = functools.partial(_bn_act_kernel, relu=relu)

    vmem2 = 2 * (len(args) + 1) * tm * cp * 4
    out = pl.pallas_call(
        kernel2,
        out_shape=jax.ShapeDtypeStruct((mp, cp), jnp.float32),
        grid_spec=pltpu.PrefetchScalarGridSpec(
            num_scalar_prefetch=0,
            grid=(nm,),
            in_specs=in_specs,
            out_specs=pl.BlockSpec((tm, cp), lambda mi: (mi, 0)),
        ),
        compiler_params=pltpu.CompilerParams(
            dimension_semantics=("parallel",),
            vmem_limit_bytes=_vmem_limit(vmem2)),
    )(*args)

    return out[:m, :cout].reshape(n, ho, wo, cout)


# -----------------------------------------------------------------------------
# Parameter init (mirrors the module's ConvBlock / BasicBlock shapes)
# -----------------------------------------------------------------------------
def init_conv_bn(key, cin, cout, ksize):
    std = (2.0 / (cout * ksize * ksize)) ** 0.5     # kaiming_normal_ fan_out
    w = jax.random.normal(key, (cout, cin, ksize, ksize), jnp.float32) * std
    return {"w": w,
            "gamma": jnp.ones((cout,), jnp.float32),
            "beta": jnp.zeros((cout,), jnp.float32)}


def init_basic_block(key, in_planes, planes, stride):
    k1, k2, k3 = jax.random.split(key, 3)
    p = {"conv1": init_conv_bn(k1, in_planes, planes, 3),
         "conv2": init_conv_bn(k2, planes, planes, 3),
         "stride": stride,
         "downsample": None}
    if stride != 1 or in_planes != planes:          # expansion = 1
        p["downsample"] = init_conv_bn(k3, in_planes, planes, 1)
    return p


# -----------------------------------------------------------------------------
# BasicBlock forward (x: NCHW like the PyTorch module; returns (out, jvp))
# -----------------------------------------------------------------------------
def basic_block_forward(params, x_nchw, jvp=None):
    # grad_proj=False => jvp path is None throughout.
    x = jnp.transpose(x_nchw, (0, 2, 3, 1))          # NCHW -> NHWC
    s = params["stride"]
    # conv1 -> bn1 -> relu
    h = conv_bn_act(x, params["conv1"]["w"], params["conv1"]["gamma"],
                    params["conv1"]["beta"], stride=s, pad=1, relu=True)
    # identity path
    if params["downsample"] is not None:
        identity = conv_bn_act(x, params["downsample"]["w"],
                               params["downsample"]["gamma"],
                               params["downsample"]["beta"],
                               stride=s, pad=0, relu=False)
    else:
        identity = x
    # conv2 -> bn2 -> (+ identity) -> relu, residual+relu fused into kernel 2
    out = conv_bn_act(h, params["conv2"]["w"], params["conv2"]["gamma"],
                      params["conv2"]["beta"], stride=1, pad=1, relu=True,
                      residual=identity)
    return jnp.transpose(out, (0, 3, 1, 2)), None    # NHWC -> NCHW, jvp=None


if __name__ == "__main__":
    key = jax.random.PRNGKey(0)
    k1, k2, kx = jax.random.split(key, 3)
    # Block with downsample (channel change + stride 2) and a plain block.
    blk1 = init_basic_block(k1, in_planes=4, planes=8, stride=2)
    blk2 = init_basic_block(k2, in_planes=8, planes=8, stride=1)
    x = jax.random.normal(kx, (2, 4, 16, 16), jnp.float32)   # [N, C, H, W]

    y1, jvp1 = basic_block_forward(blk1, x)
    y2, jvp2 = basic_block_forward(blk2, y1)
    jax.block_until_ready(y2)

    assert y1.shape == (2, 8, 8, 8)
    assert y2.shape == (2, 8, 8, 8)
    assert jvp1 is None and jvp2 is None
    print("KERNEL_OK")
</pallas_src>

<mosaic_0001>
module attributes {stable_mosaic.version = 11 : i64} {
  func.func @_gemm_stats_kernel(%arg0: i32, %arg1: i32, %arg2: memref<128x36xbf16, #tpu.memory_space<vmem>>, %arg3: memref<36x128xbf16, #tpu.memory_space<vmem>>, %arg4: memref<128x128xf32, #tpu.memory_space<vmem>>, %arg5: memref<8x128xf32, #tpu.memory_space<vmem>>) attributes {dimension_semantics = [#tpu.dimension_semantics<parallel>, #tpu.dimension_semantics<arbitrary>], iteration_bounds = array<i64: 1, 1>, scalar_prefetch = 0 : i64, scratch_operands = 0 : i64, tpu.core_type = #tpu.core_type<tc>, window_params = [{transform_indices = @transform_0, window_bounds = array<i64: 128, 36>}, {transform_indices = @transform_1, window_bounds = array<i64: 36, 128>}, {transform_indices = @transform_2, window_bounds = array<i64: 128, 128>}, {transform_indices = @transform_3, window_bounds = array<i64: 8, 128>}]} {
    %c0_i32 = arith.constant 0 : i32
    %0 = arith.cmpi eq, %arg1, %c0_i32 : i32
    %1 = arith.extui %0 : i1 to i32
    %c0_i32_0 = arith.constant 0 : i32
    %2 = arith.cmpi ne, %1, %c0_i32_0 : i32
    scf.if %2 {
      %cst_10 = arith.constant 0.000000e+00 : f32
      %12 = vector.broadcast %cst_10 : f32 to vector<128x128xf32>
      %c0_11 = arith.constant 0 : index
      %c0_12 = arith.constant 0 : index
      %13 = vector.load %arg4[%c0_11, %c0_12] : memref<128x128xf32, #tpu.memory_space<vmem>>, vector<128x128xf32>
      tpu.vector_store %arg4[%c0_11, %c0_12], %12 {strides = array<i32>} : memref<128x128xf32, #tpu.memory_space<vmem>>, vector<128x128xf32>,
    } else {
    }
    %c0 = arith.constant 0 : index
    %c0_1 = arith.constant 0 : index
    %3 = vector.load %arg4[%c0, %c0_1] : memref<128x128xf32, #tpu.memory_space<vmem>>, vector<128x128xf32>
    %c0_2 = arith.constant 0 : index
    %c0_3 = arith.constant 0 : index
    %4 = vector.load %arg2[%c0_2, %c0_3] : memref<128x36xbf16, #tpu.memory_space<vmem>>, vector<128x36xbf16>
    %c0_4 = arith.constant 0 : index
    %c0_5 = arith.constant 0 : index
    %5 = vector.load %arg3[%c0_4, %c0_5] : memref<36x128xbf16, #tpu.memory_space<vmem>>, vector<36x128xbf16>
    %cst = arith.constant dense<0.000000e+00> : vector<128x128xf32>
    %6 = tpu.matmul %4, %5, %cst {dimension_numbers = #tpu.dot_dimension_numbers<[1], [0], [0], [1], [0, 0, 1, 1], [], []>} : vector<128x36xbf16>, vector<36x128xbf16>, vector<128x128xf32> -> vector<128x128xf32>
    %7 = arith.addf %3, %6 : vector<128x128xf32>
    %c0_6 = arith.constant 0 : index
    %c0_7 = arith.constant 0 : index
    %8 = vector.load %arg4[%c0_6, %c0_7] : memref<128x128xf32, #tpu.memory_space<vmem>>, vector<128x128xf32>
    tpu.vector_store %arg4[%c0_6, %c0_7], %7 {strides = array<i32>} : memref<128x128xf32, #tpu.memory_space<vmem>>, vector<128x128xf32>,
    %c0_i32_8 = arith.constant 0 : i32
    %9 = arith.cmpi eq, %arg1, %c0_i32_8 : i32
    %10 = arith.extui %9 : i1 to i32
    %c0_i32_9 = arith.constant 0 : i32
    %11 = arith.cmpi ne, %10, %c0_i32_9 : i32
    scf.if %11 {
      %c0_10 = arith.constant 0 : index
      %c0_11 = arith.constant 0 : index
      %12 = vector.load %arg4[%c0_10, %c0_11] : memref<128x128xf32, #tpu.memory_space<vmem>>, vector<128x128xf32>
      %cst_12 = arith.constant dense<0.000000e+00> : vector<128xf32>
      %13 = vector.multi_reduction <add>, %12, %cst_12 [0] : vector<128x128xf32> to vector<128xf32>
      %14 = vector.shape_cast %13 : vector<128xf32> to vector<1x128xf32>
      %15 = arith.mulf %12, %12 : vector<128x128xf32>
      %cst_13 = arith.constant dense<0.000000e+00> : vector<128xf32>
      %16 = vector.multi_reduction <add>, %15, %cst_13 [0] : vector<128x128xf32> to vector<128xf32>
      %17 = vector.shape_cast %16 : vector<128xf32> to vector<1x128xf32>
      %18 = tpu.iota {dimensions = array<i32: 0>} : vector<8x128xi32>
      %c0_i32_14 = arith.constant 0 : i32
      %19 = vector.broadcast %c0_i32_14 : i32 to vector<8x128xi32>
      %20 = arith.cmpi eq, %18, %19 : vector<8x128xi32>
      %c1_i32 = arith.constant 1 : i32
      %21 = vector.broadcast %c1_i32 : i32 to vector<8x128xi32>
      %22 = arith.cmpi eq, %18, %21 : vector<8x128xi32>
      %cst_15 = arith.constant 0.000000e+00 : f32
      %23 = vector.shape_cast %17 : vector<1x128xf32> to vector<1x128xf32>
      %24 = vector.broadcast %23 : vector<1x128xf32> to vector<8x128xf32>
      %25 = vector.broadcast %cst_15 : f32 to vector<8x128xf32>
      %26 = arith.select %22, %24, %25 : vector<8x128xi1>, vector<8x128xf32>
      %27 = vector.shape_cast %14 : vector<1x128xf32> to vector<1x128xf32>
      %28 = vector.broadcast %27 : vector<1x128xf32> to vector<8x128xf32>
      %29 = arith.select %20, %28, %26 : vector<8x128xi1>, vector<8x128xf32>
      %c0_16 = arith.constant 0 : index
      %c0_17 = arith.constant 0 : index
      %30 = vector.load %arg5[%c0_16, %c0_17] : memref<8x128xf32, #tpu.memory_space<vmem>>, vector<8x128xf32>
      tpu.vector_store %arg5[%c0_16, %c0_17], %29 {strides = array<i32>} : memref<8x128xf32, #tpu.memory_space<vmem>>, vector<8x128xf32>,
    } else {
    }
    return
  }
  func.func @transform_0(%arg0: i32, %arg1: i32) -> (i32, i32) {
    %c0_i32 = arith.constant 0 : i32
    return %arg0, %arg1 : i32, i32
  }
  func.func @transform_1(%arg0: i32, %arg1: i32) -> (i32, i32) {
    %c0_i32 = arith.constant 0 : i32
    %c0_i32_0 = arith.constant 0 : i32
    return %arg1, %c0_i32 : i32, i32
  }
  func.func @transform_2(%arg0: i32, %arg1: i32) -> (i32, i32) {
    %c0_i32 = arith.constant 0 : i32
    %c0_i32_0 = arith.constant 0 : i32
    return %arg0, %c0_i32 : i32, i32
  }
  func.func @transform_3(%arg0: i32, %arg1: i32) -> (i32, i32) {
    %c0_i32 = arith.constant 0 : i32
    %c0_i32_0 = arith.constant 0 : i32
    return %arg0, %c0_i32 : i32, i32
  }
}

</mosaic_0001>

<bundles_post_ra>
// kernel: tpu_custom_call.1
= control target key start
LH: loop header
LB: loop body
LE: loop exit
PB: predicated region body
PF: predicated region fallthrough
CT: control target
= control target key end

     0   :  { %9 = vsyncpa [#allocation3], 0  ;;  %vm128_vm0 = vcmask 293888   ;;  %vm153_vm1 = vcmask 1041408   ;;  %s613_s0 = inlined_call_operand.vmem [shape: bf16[128,36], index: 0, kind: input, shape index: {}]   ;;  %s614_s1 = inlined_call_operand.vmem [shape: bf16[36,128], index: 1, kind: input, shape index: {}]   ;;  %s615_s2 = inlined_call_operand.hbm [shape: f32[128,128], index: 2, kind: output, shape index: {0}]   ;;  %s616_s3 = inlined_call_operand.hbm [shape: f32[8,128], index: 3, kind: output, shape index: {1}]  }
   0x1   :  { %v465_v0 = vld [vmem:[%s614_s1] sm:$0xff]   ;;  %v466_v1 = vld [vmem:[%s614_s1 + $0x8] sm:$0xff]   ;;  %v467_v2 = vld [vmem:[%s614_s1 + $0x10] ss:$0 sps:$4 sm:$0x33]  }
   0x2   :  { %430 = vmatprep.subr.bf16.mxu0 %v465_v0  ;;  %v468_v3 = vld [vmem:[%s613_s0] sm:$0xff]   ;;  %452 = vmatprep.subr.bf16.mxu1 %v465_v0  ;;  %v155_v5 = vsel %vm153_vm1, %v467_v2, 0  ;;  %v469_v6 = vld [vmem:[%s613_s0 + $0x8] sm:$0xff]  }
   0x3   :  { %431 = vmatpush3.bf16.msra.mxu0 %v465_v0  ;;  %455 = vmatpush3.bf16.msra.mxu1 %v465_v0  ;;  %v472_v4 = vld [vmem:[%s613_s0 + $0x20] sm:$0xff]   ;;  %v473_v7 = vld [vmem:[%s613_s0 + $0x28] sm:$0xff]  }
   0x4   :  { %432 = vmatprep.subr.bf16.mxu0 %v466_v1  ;;  %436 = vmatprep.mubr.msk.bf16.mxu0 %vm128_vm0, %v468_v3 }
   0x5   :  { %453 = vmatprep.subr.bf16.mxu1 %v466_v1  ;;  %444 = vmatprep.mubr.msk.bf16.mxu1 %vm128_vm0, %v472_v4 }
   0x7   :  { %433 = vmatpush3.bf16.msra.mxu0 %v466_v1  ;;  %456 = vmatpush3.bf16.msra.mxu1 %v466_v1 }
   0x8   :  { %458 = vmatprep.subr.msk.bf16.mxu0 %vm153_vm1, %v467_v2  ;;  %459 = vmatprep.subr.msk.bf16.mxu1 %vm153_vm1, %v467_v2 }
   0x9   :  { %10 = vsyncpa [#allocation5], 0  ;;  %v470_v8 = vld [vmem:[%s613_s0 + $0x10] sm:$0xff]   ;;  %v471_v10 = vld [vmem:[%s613_s0 + $0x18] sm:$0xff]  }
   0xa   :  { %v474_v9 = vld [vmem:[%s613_s0 + $0x30] sm:$0xff]   ;;  %v475_v11 = vld [vmem:[%s613_s0 + $0x38] sm:$0xff]   ;;  %s524_s0 = smov [#allocation2]  }
   0xb   :  { %435 = vmatpush3.bf16.msra.mxu0 %v155_v5  ;;  %457 = vmatpush3.bf16.msra.mxu1 %v155_v5  ;;  %s375_s6 = sshll.u32 %s524_s0, 4  ;;  %s376_s6 = int_to_ptr.vmem [resolvable:$true] %s375_s6 }
   0xc   :  { %s476_s7 = scalar_lea.vmem %s376_s6, 2048  ;;  %p481_p1 = scmp.lt.s32.totalorder %s376_s6, %s376_s6 }
   0xd   :  { %p477_p0 = scmp.ne.s32.totalorder %s376_s6, %s476_s7  ;;  %p482_p2 = scmp.lt.s32.totalorder %s476_s7, %s476_s7 }
   0xe   :  { %437 = vmatmul.mubr.msk.bf16.vlgmr.msra.gmra.mrb[0].mxu0 %vm128_vm0, %v469_v6  ;;  %445 = vmatmul.mubr.msk.bf16.vlgmr.msra.gmra.mrb[0].mxu1 %vm128_vm0, %v473_v7 }
   0xf   :  { %440 = vmatprep.mubr.msk.bf16.mxu0 %vm128_vm0, %v470_v8  ;;  %448 = vmatprep.mubr.msk.bf16.mxu1 %vm128_vm0, %v474_v9  ;;  %p483_p3 = por %p482_p2, %p481_p1 }
  0x11   :  { %p484_p4 = pnand %p483_p3, %p477_p0 }
  0x16   :  { %441 = vmatmul.mubr.msk.bf16.gmra.mrb[4].mxu0 %vm128_vm0, %v471_v10  ;;  %449 = vmatmul.mubr.msk.bf16.gmra.mrb[4].mxu1 %vm128_vm0, %v475_v11 }
  0xe1   :  { %v438_v12 = vpop.f32.mrb[0].mxu0  ;;  %v446_v13 = vpop.f32.mrb[0].mxu1 }
  0xe2   :  { %v191_v14 = vpop.f32.mrb[1].mxu0  ;;  %v223_v15 = vpop.f32.mrb[1].mxu1  ;;  %272 = vst [vmem:[#allocation2 + $0x10] sm:$0xff] %v438_v12  ;;  %280 = vst [vmem:[#allocation2 + $0x50] sm:$0xff] %v446_v13  ;;  %v328_v23 = vmul.f32 %v438_v12, %v438_v12 }
  0xe3   :  { %v439_v16 = vpop.f32.mrb[2].mxu0  ;;  %v447_v17 = vpop.f32.mrb[2].mxu1  ;;  %270 = vst [vmem:[#allocation2] sm:$0xff] %v191_v14  ;;  %278 = vst [vmem:[#allocation2 + $0x40] sm:$0xff] %v223_v15  ;;  %v326_v20 = vmul.f32 %v191_v14, %v191_v14 }
  0xe4   :  { %v194_v18 = vpop.f32.mrb[3].mxu0  ;;  %v226_v19 = vpop.f32.mrb[3].mxu1  ;;  %273 = vst [vmem:[#allocation2 + $0x18] sm:$0xff] %v439_v16  ;;  %281 = vst [vmem:[#allocation2 + $0x58] sm:$0xff] %v447_v17  ;;  %v329_v28 = vmul.f32 %v439_v16, %v439_v16 }
  0xe5   :  { %271 = vst [vmem:[#allocation2 + $0x8] sm:$0xff] %v194_v18  ;;  %v305_v21 = vadd.f32 %v194_v18, %v191_v14  ;;  %v327_v22 = vmul.f32 %v194_v18, %v194_v18  ;;  %279 = vst [vmem:[#allocation2 + $0x48] sm:$0xff] %v226_v19 }
  0xe7   :  { %v342_v24 = vadd.f32 %v327_v22, %v326_v20  ;;  %v306_v27 = vadd.f32 %v438_v12, %v305_v21 }
  0xe9   :  { %v442_v25 = vpop.f32.mrb[4].mxu0  ;;  %v450_v26 = vpop.f32.mrb[4].mxu1  ;;  %v307_v33 = vadd.f32 %v439_v16, %v306_v27  ;;  %v343_v34 = vadd.f32 %v342_v24, %v328_v23 }
  0xea   :  { %v207_v29 = vpop.f32.mrb[5].mxu0  ;;  %v239_v30 = vpop.f32.mrb[5].mxu1  ;;  %276 = vst [vmem:[#allocation2 + $0x30] sm:$0xff] %v442_v25  ;;  %284 = vst [vmem:[#allocation2 + $0x70] sm:$0xff] %v450_v26 }
  0xeb   :  { %v443_v31 = vpop.f32.mrb[6].mxu0  ;;  %v451_v32 = vpop.f32.mrb[6].mxu1  ;;  %274 = vst [vmem:[#allocation2 + $0x20] sm:$0xff] %v207_v29  ;;  %282 = vst [vmem:[#allocation2 + $0x60] sm:$0xff] %v239_v30  ;;  %v344_v37 = vadd.f32 %v343_v34, %v329_v28 }
  0xec   :  { %v210_v35 = vpop.f32.mrb[7].mxu0  ;;  %v242_v36 = vpop.f32.mrb[7].mxu1  ;;  %277 = vst [vmem:[#allocation2 + $0x38] sm:$0xff] %v443_v31  ;;  %285 = vst [vmem:[#allocation2 + $0x78] sm:$0xff] %v451_v32 }
  0xed   :  { %275 = vst [vmem:[#allocation2 + $0x28] sm:$0xff] %v210_v35  ;;  %283 = vst [vmem:[#allocation2 + $0x68] sm:$0xff] %v242_v36 }
  0xee   :  { %487 = shalt.err (!%p484_p4)
}
  0xef   :  { %s488_s10 = scalar_lea.hbm %s615_s2, 2048 }
  0xf0   :  { %p489_p5 = scmp.ne.s32.totalorder %s615_s2, %s488_s10  ;;  %p492_p6 = scmp.lt.u32.totalorder %s488_s10, %s615_s2 }
  0xf2   :  { %p494_p7 = pnand %p492_p6, %p489_p5 }
  0xf4   :  { %497 = shalt.err (!%p494_p7)
}
  0xf5   :  { %s525_s15 = smov 128   ;;  %s526_s16 = smov 8   ;;  %v293_v38 = vld [vmem:[#allocation2 + $0x20] sm:$0xff]  ;;  %v294_v41 = vld [vmem:[#allocation2 + $0x28] sm:$0xff]  ;;  %v295_v42 = vld [vmem:[#allocation2 + $0x30] sm:$0xff]  ;;  %v363_v25 = vlaneseq }
  0xf6   :  { %381 = dma.vmem_to_hbm [thread:$0]  %s376_s6, 2048, %s615_s2, [#allocation3], %s525_s15, %s525_s15, %s526_s16   ;;  %v308_v39 = vadd.f32 %v307_v33, %v293_v38  ;;  %v330_v40 = vmul.f32 %v293_v38, %v293_v38  ;;  %v331_v44 = vmul.f32 %v294_v41, %v294_v41  ;;  %v296_v46 = vld [vmem:[#allocation2 + $0x38] sm:$0xff]  ;;  %v297_v47 = vld [vmem:[#allocation2 + $0x40] sm:$0xff]  ;;  %v332_v49 = vmul.f32 %v295_v42, %v295_v42  ;;  %v298_v55 = vld [vmem:[#allocation2 + $0x48] sm:$0xff] }
  0xf7   :  { %v333_v52 = vmul.f32 %v296_v46, %v296_v46  ;;  %v334_v53 = vmul.f32 %v297_v47, %v297_v47  ;;  %v299_v58 = vld [vmem:[#allocation2 + $0x50] sm:$0xff]  ;;  %v335_v60 = vmul.f32 %v298_v55, %v298_v55  ;;  %v300_v62 = vld [vmem:[#allocation2 + $0x58] sm:$0xff]  ;;  %v301_v63 = vld [vmem:[#allocation2 + $0x60] sm:$0xff]  ;;  %v364_v30 = vshrl.u32 %v363_v25, 7  ;;  %s527_s2 = smov [#allocation4]  }
  0xf8   :  { %v309_v43 = vadd.f32 %v308_v39, %v294_v41  ;;  %v345_v45 = vadd.f32 %v344_v37, %v330_v40  ;;  %v336_v1 = vmul.f32 %v299_v58, %v299_v58  ;;  %v337_v4 = vmul.f32 %v300_v62, %v300_v62  ;;  %v302_v7 = vld [vmem:[#allocation2 + $0x68] sm:$0xff]  ;;  %v303_v10 = vld [vmem:[#allocation2 + $0x70] sm:$0xff]  ;;  %v304_v14 = vld [vmem:[#allocation2 + $0x78] sm:$0xff]  ;;  %s388_s19 = sshll.u32 %s527_s2, 4  ;;  %s389_s19 = int_to_ptr.vmem [resolvable:$true] %s388_s19 }
  0xf9   :  { %v338_v5 = vmul.f32 %v301_v63, %v301_v63  ;;  %v339_v12 = vmul.f32 %v302_v7, %v302_v7  ;;  %v340_v16 = vmul.f32 %v303_v10, %v303_v10  ;;  %v341_v19 = vmul.f32 %v304_v14, %v304_v14  ;;  %s498_s20 = scalar_lea.vmem %s389_s19, 128  ;;  %p503_p9 = scmp.lt.s32.totalorder %s389_s19, %s389_s19 }
  0xfa   :  { %v310_v48 = vadd.f32 %v309_v43, %v295_v42  ;;  %v346_v50 = vadd.f32 %v345_v45, %v331_v44  ;;  %vm366_vm2 = vcmp.eq.s32.totalorder %v364_v30, 1  ;;  %vm365_vm3 = vcmp.eq.s32.totalorder %v364_v30, 0  ;;  %p499_p8 = scmp.ne.s32.totalorder %s389_s19, %s498_s20  ;;  %p504_p10 = scmp.lt.s32.totalorder %s498_s20, %s498_s20 }
  0xfc   :  { %v311_v51 = vadd.f32 %v310_v48, %v296_v46  ;;  %v347_v54 = vadd.f32 %v346_v50, %v332_v49  ;;  %p505_p11 = por %p504_p10, %p503_p9 }
  0xfe   :  { %v312_v56 = vadd.f32 %v311_v51, %v297_v47  ;;  %v348_v57 = vadd.f32 %v347_v54, %v333_v52  ;;  %p506_p12 = pnand %p505_p11, %p499_p8 }
 0x100   :  { %v313_v59 = vadd.f32 %v312_v56, %v298_v55  ;;  %v349_v61 = vadd.f32 %v348_v57, %v334_v53 }
 0x102   :  { %v314_v0 = vadd.f32 %v313_v59, %v299_v58  ;;  %v350_v2 = vadd.f32 %v349_v61, %v335_v60 }
 0x104   :  { %v315_v3 = vadd.f32 %v314_v0, %v300_v62  ;;  %v351_v6 = vadd.f32 %v350_v2, %v336_v1 }
 0x106   :  { %v316_v8 = vadd.f32 %v315_v3, %v301_v63  ;;  %v352_v9 = vadd.f32 %v351_v6, %v337_v4 }
 0x108   :  { %v317_v11 = vadd.f32 %v316_v8, %v302_v7  ;;  %v353_v13 = vadd.f32 %v352_v9, %v338_v5 }
 0x10a   :  { %v318_v15 = vadd.f32 %v317_v11, %v303_v10  ;;  %v354_v17 = vadd.f32 %v353_v13, %v339_v12 }
 0x10c   :  { %v319_v18 = vadd.f32 %v318_v15, %v304_v14  ;;  %v355_v20 = vadd.f32 %v354_v17, %v340_v16 }
 0x10e   :  { %v320_v21 = vrot.slane %v319_v18, 4  ;;  %v356_v22 = vadd.f32 %v355_v20, %v341_v19 }
 0x110   :  { %v321_v23 = vadd.f32 %v320_v21, %v319_v18  ;;  %v357_v24 = vrot.slane %v356_v22, 4 }
 0x112   :  { %v322_v26 = vrot.slane %v321_v23, 2  ;;  %v358_v27 = vadd.f32 %v357_v24, %v356_v22 }
 0x114   :  { %v323_v28 = vadd.f32 %v322_v26, %v321_v23  ;;  %v359_v29 = vrot.slane %v358_v27, 2 }
 0x116   :  { %v360_v31 = vadd.f32 %v359_v29, %v358_v27  ;;  %v324_v32 = vrot.slane %v323_v28, 1 }
 0x118   :  { %v361_v33 = vrot.slane %v360_v31, 1  ;;  %v325_v35 = vadd.f32 %v324_v32, %v323_v28 }
 0x11a   :  { %v362_v34 = vadd.f32 %v361_v33, %v360_v31 }
 0x11c   :  { %v367_v36 = vsel %vm366_vm2, %v362_v34, 0.0 }
 0x11d   :  { %v368_v37 = vsel %vm365_vm3, %v325_v35, %v367_v36 }
 0x11e   :  { %369 = vst [vmem:[#allocation4] sm:$0xff] %v368_v37 }
 0x11f   :  { %509 = shalt.err (!%p506_p12)
}
 0x120   :  { %s510_s22 = scalar_lea.hbm %s616_s3, 128 }
 0x121   :  { %p511_p13 = scmp.ne.s32.totalorder %s616_s3, %s510_s22  ;;  %p514_p0 = scmp.lt.u32.totalorder %s510_s22, %s616_s3 }
 0x123   :  { %p516_p1 = pnand %p514_p0, %p511_p13 }
 0x125   :  { %519 = shalt.err (!%p516_p1)
}
 0x126   :  { %391 = dma.vmem_to_hbm [thread:$0]  %s389_s19, 128, %s616_s3, [#allocation5]  }
 0x127   :  { %520 = dma.done.wait [#allocation3], 2048  }
 0x128   :  { %521 = vsyncadd [#allocation3], 4294965248 }
 0x129   :  { %522 = dma.done.wait [#allocation5], 128  }
 0x12a   :  { %523 = vsyncadd [#allocation5], 4294967168 }
 0x12b   :  { %398 = vsyncpa [#allocation3], 1 }
 0x12c   :  { %399 = vsyncpa [#allocation5], 1 }

</bundles_post_ra>
